<compile_context>
chip_gen: v5e
topology: v5e:2x2
jax: 0.10.0
libtpu: 0.0.40
codegen_flags: <defaults>
</compile_context>

<pallas_src>
import jax
import jax.numpy as jnp
from jax.experimental import pallas as pl
from jax.experimental.pallas import tpu as pltpu


# ------------------------------ small helpers ------------------------------
def _round_up(x, m):
    return ((x + m - 1) // m) * m


def _round_down(x, m):
    return (x // m) * m


def _cdiv(a, b):
    return (a + b - 1) // b


def _vmem_budget_bytes():
    """(physical VMEM, working budget) — leave headroom for compiler scratch."""
    try:
        cap = int(pltpu.get_tpu_info().vmem_capacity_bytes)
    except Exception:
        cap = 64 * 1024 * 1024          # conservative: v7x per-TC physical VMEM
    return cap, int(cap * 0.70)


def _resident_spec(block_shape, index_map):
    """BlockSpec for a block whose index never changes: single-buffer it."""
    if hasattr(pl, "Buffered"):
        try:
            return pl.BlockSpec(block_shape, index_map,
                                pipeline_mode=pl.Buffered(1))
        except TypeError:
            pass                        # older API: fall back to default buffering
    return pl.BlockSpec(block_shape, index_map)


def _choose_row_tiling(n, max_tm):
    """Pick a row tile (multiple of 8) and padded row count.

    Pads N only to a multiple of 8 where possible (no 2x blow-up), and splits
    a single-tile batch in two so both v7x TensorCores get work.
    """
    n8 = _round_up(n, 8)
    if n8 <= max_tm:
        if n8 >= 256:                   # enough rows to feed 2 TensorCores
            tm = _round_up(_cdiv(n8, 2), 8)
            return tm, 2 * tm
        return n8, n8
    # Large N: biggest tm <= max_tm (multiple of 8) that minimizes padded rows.
    best_tm, best_pad = 128, None
    t = max_tm
    while t >= 128:
        pad = _round_up(n8, t) - n8
        if best_pad is None or pad < best_pad:
            best_tm, best_pad = t, pad
            if pad == 0:
                break
        t -= 8
    return best_tm, _round_up(n8, best_tm)


# --------------------------------- kernel ----------------------------------
def _logreg_kernel(x_ref, w_ref, b_ref, o_ref, acc_ref):
    # x_ref: (tm, tk), w_ref: (tk, Cp), b_ref: (1, Cp) f32,
    # o_ref: (tm, Cp), acc_ref: (tm, Cp) f32 scratch.
    k = pl.program_id(1)

    @pl.when(k == 0)
    def _():
        acc_ref[...] = jnp.zeros_like(acc_ref)

    acc_ref[...] += jax.lax.dot_general(
        x_ref[...], w_ref[...],
        dimension_numbers=(((1,), (0,)), ((), ())),   # (M, K) x (K, N) on the MXU
        preferred_element_type=jnp.float32,           # f32 accumulation
    )

    @pl.when(k == pl.num_programs(1) - 1)
    def _():
        o_ref[...] = (acc_ref[...] + b_ref[...]).astype(o_ref.dtype)


# --------------------------------- wrapper ---------------------------------
def make_logreg(weight, bias, *, use_bf16=False, allow_fast_path=True,
                fast_path_flops=32 * 1024):
    """Build a jitted forward fn: seq [N, ft_in] -> logits [N, nb_classes].

    weight: [nb_classes, ft_in] (PyTorch nn.Linear layout), bias: [nb_classes].
    All layout plumbing (transpose, class / feature padding, dtype cast) is
    done ONCE here, not per forward call.
    """
    nb_classes, ft_in = weight.shape
    compute_dtype = jnp.bfloat16 if use_bf16 else weight.dtype
    in_bytes = jnp.dtype(compute_dtype).itemsize
    c_pad = _round_up(nb_classes, 128)

    cap_bytes, budget = _vmem_budget_bytes()

    # --- K (feature) tiling decision: keep W^T fully resident when it fits,
    # otherwise stream it over a K grid axis in 128-aligned chunks. ----------
    if ft_in * c_pad * in_bytes <= budget // 3:
        tk = ft_in                       # single K step, W^T resident, no F pad
    else:
        tk = (budget // 3) // (2 * c_pad * in_bytes)
        tk = max(128, min(2048, _round_down(tk, 128)))
    f_pad = ft_in if tk == ft_in else _round_up(ft_in, tk)
    grid_k = f_pad // tk
    w_resident_bytes = (1 if grid_k == 1 else 2) * tk * c_pad * in_bytes

    # --- one-time layout plumbing for the params ----------------------------
    w_t = jnp.zeros((f_pad, c_pad), dtype=compute_dtype)
    w_t = w_t.at[:ft_in, :nb_classes].set(weight.T.astype(compute_dtype))
    b2d = jnp.zeros((1, c_pad), dtype=jnp.float32)
    b2d = b2d.at[0, :nb_classes].set(bias.astype(jnp.float32))

    def _fwd(seq):
        n, f_in = seq.shape
        if f_in != ft_in:
            raise ValueError(f"expected ft_in={ft_in}, got {f_in}")
        out_dtype = seq.dtype
        out_bytes = jnp.dtype(out_dtype).itemsize

        if allow_fast_path and 2 * n * ft_in * nb_classes < fast_path_flops:
            # Sub-vreg problem: pallas_call fixed overhead dominates; let XLA fuse.
            y = jnp.dot(seq.astype(compute_dtype), w_t[:ft_in, :nb_classes],
                        preferred_element_type=jnp.float32)
            return (y + b2d[0, :nb_classes]).astype(out_dtype)

        # --- row (M) tiling, sized from the VMEM budget ---------------------
        per_row = (2 * tk * in_bytes          # x tile, double-buffered
                   + 2 * c_pad * out_bytes    # out tile, double-buffered
                   + c_pad * 4)               # f32 accumulator scratch
        max_tm = (budget - w_resident_bytes - 2 * c_pad * 4) // per_row
        max_tm = max(128, min(2048, _round_down(max_tm, 8)))
        tm, n_pad = _choose_row_tiling(n, max_tm)
        grid_m = n_pad // tm

        # Pad / cast x only when actually needed (rows to a multiple of tm,
        # features only when K-tiling forced f_pad > ft_in).
        x = seq.astype(compute_dtype)
        if n_pad != n or f_pad != ft_in:
            xp = jnp.zeros((n_pad, f_pad), dtype=compute_dtype)
            x = xp.at[:n, :ft_in].set(x)

        # VMEM limit: actual need + slack, comfortably under physical capacity.
        usage = (2 * tm * tk * in_bytes
                 + w_resident_bytes
                 + 2 * c_pad * 4
                 + 2 * tm * c_pad * out_bytes
                 + tm * c_pad * 4)
        vmem_limit = min(max(usage + (4 << 20), 32 << 20), cap_bytes - (8 << 20))

        w_shape, w_map = (tk, c_pad), (lambda i, k: (k, 0))
        w_spec = (_resident_spec(w_shape, w_map) if grid_k == 1
                  else pl.BlockSpec(w_shape, w_map))

        out_padded = pl.pallas_call(
            _logreg_kernel,
            out_shape=jax.ShapeDtypeStruct((n_pad, c_pad), out_dtype),
            grid=(grid_m, grid_k),
            in_specs=[
                pl.BlockSpec((tm, tk), lambda i, k: (i, k)),     # x streams
                w_spec,                                          # W^T
                _resident_spec((1, c_pad), lambda i, k: (0, 0)),  # bias
            ],
            out_specs=pl.BlockSpec((tm, c_pad), lambda i, k: (i, 0)),
            scratch_shapes=[pltpu.VMEM((tm, c_pad), jnp.float32)],
            compiler_params=pltpu.CompilerParams(
                dimension_semantics=("parallel", "arbitrary"),
                vmem_limit_bytes=int(vmem_limit),
            ),
        )(x, w_t, b2d)

        return out_padded[:n, :nb_classes]

    return jax.jit(_fwd)


def logreg_forward(seq, weight, bias, *, use_bf16=False):
    """One-shot convenience wrapper (prefer make_logreg for repeated calls)."""
    return make_logreg(weight, bias, use_bf16=use_bf16)(seq)


def init_logreg_params(key, ft_in, nb_classes, dtype=jnp.float32):
    # Matches the PyTorch module: xavier_uniform_ weight, zero bias.
    bound = float(jnp.sqrt(6.0 / (ft_in + nb_classes)))
    weight = jax.random.uniform(
        key, (nb_classes, ft_in), minval=-bound, maxval=bound, dtype=dtype)
    bias = jnp.zeros((nb_classes,), dtype=dtype)
    return weight, bias


if __name__ == "__main__":
    key = jax.random.PRNGKey(0)
    k_w, k_x = jax.random.split(key)

    N, FT_IN, NB_CLASSES = 300, 32, 10
    weight, bias = init_logreg_params(k_w, FT_IN, NB_CLASSES)
    seq = jax.random.normal(k_x, (N, FT_IN), dtype=jnp.float32)

    # Precision-policy-independent f32 reference (pure VPU multiply+sum).
    ref = jnp.sum(seq[:, None, :] * weight[None, :, :], axis=-1) + bias

    # Default path: f32 operands, strict tolerance.
    fwd_f32 = make_logreg(weight, bias, use_bf16=False, allow_fast_path=False)
    out = jax.block_until_ready(fwd_f32(seq))
    assert out.shape == (N, NB_CLASSES)
    assert jnp.allclose(out, ref, atol=1e-5, rtol=1e-5)

    # Bandwidth-optimized path: bf16 operands, f32 accumulation, relaxed tol.
    fwd_bf16 = make_logreg(weight, bias, use_bf16=True, allow_fast_path=False)
    out_bf16 = jax.block_until_ready(fwd_bf16(seq))
    assert out_bf16.shape == (N, NB_CLASSES)
    assert jnp.allclose(out_bf16, ref, atol=5e-2, rtol=5e-2)

    print("KERNEL_OK")
</pallas_src>

<mosaic_0001>
module attributes {stable_mosaic.version = 11 : i64} {
  func.func @_logreg_kernel(%arg0: i32, %arg1: i32, %arg2: memref<152x32xf32, #tpu.memory_space<vmem>>, %arg3: memref<32x128xf32, #tpu.memory_space<vmem>>, %arg4: memref<1x128xf32, #tpu.memory_space<vmem>>, %arg5: memref<152x128xf32, #tpu.memory_space<vmem>>, %arg6: memref<152x128xf32, #tpu.memory_space<vmem>>) attributes {dimension_semantics = [#tpu.dimension_semantics<parallel>, #tpu.dimension_semantics<arbitrary>], iteration_bounds = array<i64: 2, 1>, scalar_prefetch = 0 : i64, scratch_operands = 1 : i64, tpu.core_type = #tpu.core_type<tc>, window_params = [{transform_indices = @transform_0, window_bounds = array<i64: 152, 32>}, {pipeline_mode = #tpu.pipeline_mode<synchronous>, transform_indices = @transform_1, window_bounds = array<i64: 32, 128>}, {pipeline_mode = #tpu.pipeline_mode<synchronous>, transform_indices = @transform_2, window_bounds = array<i64: 1, 128>}, {transform_indices = @transform_3, window_bounds = array<i64: 152, 128>}]} {
    %c0_i32 = arith.constant 0 : i32
    %0 = arith.cmpi eq, %arg1, %c0_i32 : i32
    %1 = arith.extui %0 : i1 to i32
    %c0_i32_0 = arith.constant 0 : i32
    %2 = arith.cmpi ne, %1, %c0_i32_0 : i32
    scf.if %2 {
      %cst_10 = arith.constant 0.000000e+00 : f32
      %12 = vector.broadcast %cst_10 : f32 to vector<152x128xf32>
      %c0_11 = arith.constant 0 : index
      %c0_12 = arith.constant 0 : index
      %13 = vector.load %arg6[%c0_11, %c0_12] : memref<152x128xf32, #tpu.memory_space<vmem>>, vector<152x128xf32>
      tpu.vector_store %arg6[%c0_11, %c0_12], %12 {strides = array<i32>} : memref<152x128xf32, #tpu.memory_space<vmem>>, vector<152x128xf32>,
    } else {
    }
    %c0 = arith.constant 0 : index
    %c0_1 = arith.constant 0 : index
    %3 = vector.load %arg6[%c0, %c0_1] : memref<152x128xf32, #tpu.memory_space<vmem>>, vector<152x128xf32>
    %c0_2 = arith.constant 0 : index
    %c0_3 = arith.constant 0 : index
    %4 = vector.load %arg2[%c0_2, %c0_3] : memref<152x32xf32, #tpu.memory_space<vmem>>, vector<152x32xf32>
    %c0_4 = arith.constant 0 : index
    %c0_5 = arith.constant 0 : index
    %5 = vector.load %arg3[%c0_4, %c0_5] : memref<32x128xf32, #tpu.memory_space<vmem>>, vector<32x128xf32>
    %cst = arith.constant dense<0.000000e+00> : vector<152x128xf32>
    %6 = tpu.matmul %4, %5, %cst {dimension_numbers = #tpu.dot_dimension_numbers<[1], [0], [0], [1], [0, 0, 1, 1], [], []>} : vector<152x32xf32>, vector<32x128xf32>, vector<152x128xf32> -> vector<152x128xf32>
    %7 = arith.addf %3, %6 : vector<152x128xf32>
    %c0_6 = arith.constant 0 : index
    %c0_7 = arith.constant 0 : index
    %8 = vector.load %arg6[%c0_6, %c0_7] : memref<152x128xf32, #tpu.memory_space<vmem>>, vector<152x128xf32>
    tpu.vector_store %arg6[%c0_6, %c0_7], %7 {strides = array<i32>} : memref<152x128xf32, #tpu.memory_space<vmem>>, vector<152x128xf32>,
    %c0_i32_8 = arith.constant 0 : i32
    %9 = arith.cmpi eq, %arg1, %c0_i32_8 : i32
    %10 = arith.extui %9 : i1 to i32
    %c0_i32_9 = arith.constant 0 : i32
    %11 = arith.cmpi ne, %10, %c0_i32_9 : i32
    scf.if %11 {
      %c0_10 = arith.constant 0 : index
      %c0_11 = arith.constant 0 : index
      %12 = vector.load %arg6[%c0_10, %c0_11] : memref<152x128xf32, #tpu.memory_space<vmem>>, vector<152x128xf32>
      %c0_12 = arith.constant 0 : index
      %c0_13 = arith.constant 0 : index
      %13 = vector.load %arg4[%c0_12, %c0_13] : memref<1x128xf32, #tpu.memory_space<vmem>>, vector<1x128xf32>
      %14 = vector.broadcast %13 : vector<1x128xf32> to vector<152x128xf32>
      %15 = arith.addf %12, %14 : vector<152x128xf32>
      %c0_14 = arith.constant 0 : index
      %c0_15 = arith.constant 0 : index
      %16 = vector.load %arg5[%c0_14, %c0_15] : memref<152x128xf32, #tpu.memory_space<vmem>>, vector<152x128xf32>
      tpu.vector_store %arg5[%c0_14, %c0_15], %15 {strides = array<i32>} : memref<152x128xf32, #tpu.memory_space<vmem>>, vector<152x128xf32>,
    } else {
    }
    return
  }
  func.func @transform_0(%arg0: i32, %arg1: i32) -> (i32, i32) {
    %c0_i32 = arith.constant 0 : i32
    return %arg0, %arg1 : i32, i32
  }
  func.func @transform_1(%arg0: i32, %arg1: i32) -> (i32, i32) {
    %c0_i32 = arith.constant 0 : i32
    %c0_i32_0 = arith.constant 0 : i32
    return %arg1, %c0_i32 : i32, i32
  }
  func.func @transform_2(%arg0: i32, %arg1: i32) -> (i32, i32) {
    %c0_i32 = arith.constant 0 : i32
    %c0_i32_0 = arith.constant 0 : i32
    %c0_i32_1 = arith.constant 0 : i32
    return %c0_i32, %c0_i32_0 : i32, i32
  }
  func.func @transform_3(%arg0: i32, %arg1: i32) -> (i32, i32) {
    %c0_i32 = arith.constant 0 : i32
    %c0_i32_0 = arith.constant 0 : i32
    return %arg0, %c0_i32 : i32, i32
  }
}

</mosaic_0001>

<bundles_post_ra>
// kernel: _fwd.1
= control target key start
LH: loop header
LB: loop body
LE: loop exit
PB: predicated region body
PF: predicated region fallthrough
CT: control target
= control target key end

     0   :  { %s711_s12 = smov 0   ;;  %s713_s13 = smov 0   ;;  %s827_s0 = inlined_call_operand.vmem [shape: f32[304,32], index: 0, kind: input, shape index: {}]   ;;  %s828_s1 = inlined_call_operand.vmem [shape: f32[32,128], index: 1, kind: input, shape index: {}]   ;;  %s829_s2 = inlined_call_operand.vmem [shape: f32[1,128], index: 2, kind: input, shape index: {}]   ;;  %s830_s3 = inlined_call_operand.vmem [shape: f32[304,128], index: 3, kind: output, shape index: {}]  }
   0x1   :  { %s715_s14 = smov 0  }
   0x2 LB: > { %s25_s15 = sadd.s32 1, %s685_s13  ;;  %p606_p0 = scmp.ge.s32.totalorder %s689_s14, 1  ;;  %s689_s14 = sphi %s715_s14, %s13_s14   ;;  %s685_s13 = sphi %s713_s13, %s832_s13   ;;  %s681_s12 = sphi %s711_s12, %s831_s12  }
   0x3   : > { %p27_p1 = scmp.ge.s32.totalorder %s25_s15, 2  ;;  %p166_p2 = scmp.lt.s32.totalorder %s689_s14, 3 }
   0x5   : > { %s834_s15 = smov (%p27_p1, %s25_s15), 0  ;;  %p167_p3 = pnand %p606_p0, %p166_p2 }
   0x6   : > { %s198_s20 = smul.u32 (!%p167_p3), 19, %s681_s12 }
   0x7   : > { %170 = sbr.rel (%p167_p3) target bundleno = 188 (0xbc), region = 32 }
   0x8   : > { %p199_p4 = scmp.lt.s32.totalorder (!%p167_p3), %s198_s20, 37 }
   0xc   : > { %v283_v0 = vld [vmem:[%s828_s1 + $0x18] sm:$0xff]  ;;  %v282_v1 = vld [vmem:[%s828_s1 + $0x10] sm:$0xff]  ;;  %v281_v2 = vld [vmem:[%s828_s1 + $0x8] sm:$0xff]  ;;  %s836_s20 = smov (!%p199_p4, %s198_s20), 37  ;;  %vm284_vm0 = vcmask 261120  }
   0xd   : > { %631 = vmatpush.msra.mxu2 %v283_v0  ;;  %354 = vmatpush.msra.mxu0 %v283_v0  ;;  %v280_v3 = vld [vmem:[%s828_s1] sm:$0xff]  ;;  %s607_s25 = sshll.u32 %s836_s20, 3 }
   0xe   : > { %630 = vmatpush.msra.mxu1 %v283_v0  ;;  %632 = vmatpush.msra.mxu3 %v283_v0  ;;  %s749_s28 = scalar_lea.vmem %s827_s0, %s607_s25  ;;  %v666_v23 = vld [vmem:[%s829_s2] ss:$0 sm:$0xff]  ;;  %s797_s6 = scalar_lea.vmem %s830_s3, %s607_s25 }
   0xf   : > { %634 = vmatpush.msra.mxu2 %v282_v1  ;;  %355 = vmatpush.msra.mxu0 %v282_v1  ;;  %v271_v4 = vld [vmem:[%s749_s28 + $0x50] sm:$0xff]  ;;  %v261_v5 = vld [vmem:[%s749_s28] sm:$0xff]  ;;  %v266_v6 = vld [vmem:[%s749_s28 + $0x28] sm:$0xff] }
  0x10   : > { %633 = vmatpush.msra.mxu1 %v282_v1  ;;  %635 = vmatpush.msra.mxu3 %v282_v1  ;;  %v276_v7 = vld [vmem:[%s749_s28 + $0x78] sm:$0xff]  ;;  %v262_v9 = vld [vmem:[%s749_s28 + $0x8] sm:$0xff]  ;;  %v267_v10 = vld [vmem:[%s749_s28 + $0x30] sm:$0xff] }
  0x11   : > { %637 = vmatpush.msra.mxu2 %v281_v2  ;;  %356 = vmatpush.msra.mxu0 %v281_v2  ;;  %v272_v8 = vld [vmem:[%s749_s28 + $0x58] sm:$0xff]  ;;  %v277_v11 = vld [vmem:[%s749_s28 + $0x80] sm:$0xff]  ;;  %v263_v13 = vld [vmem:[%s749_s28 + $0x10] sm:$0xff] }
  0x12   : > { %636 = vmatpush.msra.mxu1 %v281_v2  ;;  %638 = vmatpush.msra.mxu3 %v281_v2  ;;  %v273_v12 = vld [vmem:[%s749_s28 + $0x60] sm:$0xff]  ;;  %v268_v14 = vld [vmem:[%s749_s28 + $0x38] sm:$0xff]  ;;  %v278_v15 = vld [vmem:[%s749_s28 + $0x88] sm:$0xff] }
  0x13   : > { %640 = vmatpush.msra.mxu2 %v280_v3  ;;  %357 = vmatpush.msra.mxu0 %v280_v3  ;;  %v274_v16 = vld [vmem:[%s749_s28 + $0x68] sm:$0xff]  ;;  %v264_v17 = vld [vmem:[%s749_s28 + $0x18] sm:$0xff]  ;;  %v269_v18 = vld [vmem:[%s749_s28 + $0x40] sm:$0xff] }
  0x14   : > { %639 = vmatpush.msra.mxu1 %v280_v3  ;;  %641 = vmatpush.msra.mxu3 %v280_v3  ;;  %v279_v19 = vld [vmem:[%s749_s28 + $0x90] sm:$0xff]  ;;  %v265_v21 = vld [vmem:[%s749_s28 + $0x20] sm:$0xff]  ;;  %v270_v22 = vld [vmem:[%s749_s28 + $0x48] sm:$0xff] }
  0x15   : > { %619 = vmatmul.msk.f32.vlgmr.msra.gmra.mxu2 %vm284_vm0, %v271_v4  ;;  %609 = vmatmul.msk.f32.vlgmr.msra.gmra.mxu0 %vm284_vm0, %v261_v5  ;;  %v275_v20 = vld [vmem:[%s749_s28 + $0x70] sm:$0xff] }
  0x16   : > { %614 = vmatmul.msk.f32.vlgmr.msra.gmra.mxu1 %vm284_vm0, %v266_v6  ;;  %624 = vmatmul.msk.f32.vlgmr.msra.gmra.mxu3 %vm284_vm0, %v276_v7 }
  0x1d   : > { %620 = vmatmul.msk.f32.gmra.mxu2 %vm284_vm0, %v272_v8  ;;  %610 = vmatmul.msk.f32.gmra.mxu0 %vm284_vm0, %v262_v9 }
  0x1e   : > { %615 = vmatmul.msk.f32.gmra.mxu1 %vm284_vm0, %v267_v10  ;;  %625 = vmatmul.msk.f32.gmra.mxu3 %vm284_vm0, %v277_v11 }
  0x25   : > { %621 = vmatmul.msk.f32.gmra.mxu2 %vm284_vm0, %v273_v12  ;;  %611 = vmatmul.msk.f32.gmra.mxu0 %vm284_vm0, %v263_v13 }
  0x26   : > { %616 = vmatmul.msk.f32.gmra.mxu1 %vm284_vm0, %v268_v14  ;;  %626 = vmatmul.msk.f32.gmra.mxu3 %vm284_vm0, %v278_v15 }
  0x2d   : > { %622 = vmatmul.msk.f32.gmra.mxu2 %vm284_vm0, %v274_v16  ;;  %612 = vmatmul.msk.f32.gmra.mxu0 %vm284_vm0, %v264_v17 }
  0x2e   : > { %617 = vmatmul.msk.f32.gmra.mxu1 %vm284_vm0, %v269_v18  ;;  %627 = vmatmul.msk.f32.gmra.mxu3 %vm284_vm0, %v279_v19 }
  0x35   : > { %623 = vmatmul.msk.f32.gmra.mxu2 %vm284_vm0, %v275_v20  ;;  %613 = vmatmul.msk.f32.gmra.mxu0 %vm284_vm0, %v265_v21 }
  0x36   : > { %618 = vmatmul.msk.f32.gmra.mxu1 %vm284_vm0, %v270_v22 }
  0x92   : > { %v359_v24 = vpop.f32.mrf.mxu0 }
  0x93   : > { %v480_v25 = vadd.f32 %v666_v23, %v359_v24  ;;  %v374_v26 = vpop.f32.mrf.mxu1 }
  0x94   : > { %v485_v27 = vadd.f32 %v666_v23, %v374_v26 }
  0x95   : > { %499 = vst [vmem:[%s797_s6] sm:$0xff] %v480_v25 }
  0x96   : > { %504 = vst [vmem:[%s797_s6 + $0x28] sm:$0xff] %v485_v27 }
  0x98   : > { %v389_v28 = vpop.f32.mrf.mxu2 }
  0x99   : > { %v490_v29 = vadd.f32 %v666_v23, %v389_v28  ;;  %v404_v30 = vpop.f32.mrf.mxu3 }
  0x9a   : > { %v362_v31 = vpop.f32.mrf.mxu0  ;;  %v495_v32 = vadd.f32 %v666_v23, %v404_v30 }
  0x9b   : > { %509 = vst [vmem:[%s797_s6 + $0x50] sm:$0xff] %v490_v29  ;;  %v481_v33 = vadd.f32 %v666_v23, %v362_v31  ;;  %v377_v34 = vpop.f32.mrf.mxu1 }
  0x9c   : > { %v486_v35 = vadd.f32 %v666_v23, %v377_v34  ;;  %514 = vst [vmem:[%s797_s6 + $0x78] sm:$0xff] %v495_v32 }
  0x9d   : > { %500 = vst [vmem:[%s797_s6 + $0x8] sm:$0xff] %v481_v33 }
  0x9e   : > { %505 = vst [vmem:[%s797_s6 + $0x30] sm:$0xff] %v486_v35 }
  0xa0   : > { %v392_v36 = vpop.f32.mrf.mxu2 }
  0xa1   : > { %v491_v37 = vadd.f32 %v666_v23, %v392_v36  ;;  %v407_v38 = vpop.f32.mrf.mxu3 }
  0xa2   : > { %v365_v39 = vpop.f32.mrf.mxu0  ;;  %v496_v40 = vadd.f32 %v666_v23, %v407_v38 }
  0xa3   : > { %510 = vst [vmem:[%s797_s6 + $0x58] sm:$0xff] %v491_v37  ;;  %v482_v41 = vadd.f32 %v666_v23, %v365_v39  ;;  %v380_v42 = vpop.f32.mrf.mxu1 }
  0xa4   : > { %v487_v43 = vadd.f32 %v666_v23, %v380_v42  ;;  %515 = vst [vmem:[%s797_s6 + $0x80] sm:$0xff] %v496_v40 }
  0xa5   : > { %501 = vst [vmem:[%s797_s6 + $0x10] sm:$0xff] %v482_v41 }
  0xa6   : > { %506 = vst [vmem:[%s797_s6 + $0x38] sm:$0xff] %v487_v43 }
  0xa8   : > { %v395_v44 = vpop.f32.mrf.mxu2 }
  0xa9   : > { %v492_v45 = vadd.f32 %v666_v23, %v395_v44  ;;  %v410_v46 = vpop.f32.mrf.mxu3 }
  0xaa   : > { %v368_v47 = vpop.f32.mrf.mxu0  ;;  %v497_v48 = vadd.f32 %v666_v23, %v410_v46 }
  0xab   : > { %511 = vst [vmem:[%s797_s6 + $0x60] sm:$0xff] %v492_v45  ;;  %v483_v49 = vadd.f32 %v666_v23, %v368_v47  ;;  %v383_v50 = vpop.f32.mrf.mxu1 }
  0xac   : > { %v488_v51 = vadd.f32 %v666_v23, %v383_v50  ;;  %516 = vst [vmem:[%s797_s6 + $0x88] sm:$0xff] %v497_v48 }
  0xad   : > { %502 = vst [vmem:[%s797_s6 + $0x18] sm:$0xff] %v483_v49 }
  0xae   : > { %507 = vst [vmem:[%s797_s6 + $0x40] sm:$0xff] %v488_v51 }
  0xb0   : > { %v398_v52 = vpop.f32.mrf.mxu2 }
  0xb1   : > { %v493_v53 = vadd.f32 %v666_v23, %v398_v52  ;;  %v413_v54 = vpop.f32.mrf.mxu3 }
  0xb2   : > { %v371_v55 = vpop.f32.mrf.mxu0  ;;  %v498_v56 = vadd.f32 %v666_v23, %v413_v54 }
  0xb3   : > { %512 = vst [vmem:[%s797_s6 + $0x68] sm:$0xff] %v493_v53  ;;  %v484_v57 = vadd.f32 %v666_v23, %v371_v55  ;;  %v386_v58 = vpop.f32.mrf.mxu1 }
  0xb4   : > { %v489_v59 = vadd.f32 %v666_v23, %v386_v58  ;;  %517 = vst [vmem:[%s797_s6 + $0x90] sm:$0xff] %v498_v56 }
  0xb5   : > { %503 = vst [vmem:[%s797_s6 + $0x20] sm:$0xff] %v484_v57 }
  0xb6   : > { %508 = vst [vmem:[%s797_s6 + $0x48] sm:$0xff] %v489_v59 }
  0xb8   : > { %v401_v60 = vpop.f32.mrf.mxu2 }
  0xb9   : > { %v494_v61 = vadd.f32 %v666_v23, %v401_v60 }
  0xbb   : > { %513 = vst [vmem:[%s797_s6 + $0x70] sm:$0xff] %v494_v61 }
  0xbc PF: > { %s13_s14 = sadd.s32 1, %s689_s14   ;;  %s831_s12 = smov %s685_s13 }
  0xbd   : > { %p10_p5 = scmp.ge.s32.totalorder %s13_s14, 4   ;;  %s832_s13 = smov %s834_s15 }
  0xbf   :  { %12 = sbr.rel (!%p10_p5) target bundleno = 2 (0x2), region = 73 }

</bundles_post_ra>
